<compile_context>
chip_gen: v7x
topology: tpu7x:2x2x1
jax: 0.10.0
libtpu: 0.0.40
codegen_flags: <defaults>
</compile_context>

<pallas_src>
import functools

import numpy as np
import jax
import jax.numpy as jnp
from jax.experimental import pallas as pl
from jax.experimental.pallas import tpu as pltpu

BN_EPS = 1e-5
ACT_DTYPE = jnp.bfloat16            # MXU operand / activation storage dtype
LAYER_CHANNELS = (64, 128, 256, 512)


def _vmem_spec():
    return pl.BlockSpec(memory_space=pltpu.MemorySpace.VMEM)


# ----------------------------------------------------------------------------
# Pallas kernels (single grid step each; operands live fully in VMEM)
# ----------------------------------------------------------------------------
def _mm_bn_kernel(x_ref, w_ref, s_ref, o_ref, *, relu):
    """o = [relu](x @ w + shift).  x:[M,K] bf16, w:[K,N] bf16, shift:[1,N] f32."""
    acc = jnp.dot(x_ref[...], w_ref[...], preferred_element_type=jnp.float32)
    acc = acc + s_ref[...]
    if relu:
        acc = jnp.maximum(acc, 0.0)
    o_ref[...] = acc.astype(o_ref.dtype)


def _mm_bn_res_kernel(x_ref, w_ref, s_ref, r_ref, o_ref):
    """o = relu(x @ w + shift + residual)  (fused BasicBlock tail)."""
    acc = jnp.dot(x_ref[...], w_ref[...], preferred_element_type=jnp.float32)
    acc = acc + s_ref[...] + r_ref[...].astype(jnp.float32)
    o_ref[...] = jnp.maximum(acc, 0.0).astype(o_ref.dtype)


def _mm_bn_dual_kernel(x_ref, w_ref, s_ref, o1_ref, o2_ref, *, n1):
    """Fused block-conv1 + 1x1 downsample sharing one patch slab.
       o1 = relu((x@w + shift)[:, :n1])   main path
       o2 =       (x@w + shift)[:, n1:]   shortcut (no ReLU)."""
    acc = jnp.dot(x_ref[...], w_ref[...], preferred_element_type=jnp.float32)
    acc = acc + s_ref[...]
    o1_ref[...] = jnp.maximum(acc[:, :n1], 0.0).astype(o1_ref.dtype)
    o2_ref[...] = acc[:, n1:].astype(o2_ref.dtype)


def _maxpool_kernel(ew_ref, ow_ref, owp_ref, o_ref):
    """MaxPool2d(3, stride=2, pad=1) on NHWC.
    The wrapper supplies the even-column / odd-column / shifted-odd-column
    phases so the kernel only needs elementwise max, a free major-dim reshape
    and a major-dim concat.  Inputs: [Nb,H,Wo,C]; output: [Nb,H//2,Wo,C]."""
    xw = jnp.maximum(jnp.maximum(ew_ref[...], ow_ref[...]), owp_ref[...])
    nb, h, wo, c = xw.shape
    v = xw.reshape(nb, h // 2, 2, wo, c)          # split H (major dim): free
    eh, oh = v[:, :, 0], v[:, :, 1]
    neg = jnp.full((nb, 1, wo, c), jnp.finfo(xw.dtype).min, xw.dtype)
    ohp = jnp.concatenate([neg, oh[:, :-1]], axis=1)        # rows 2*oh - 1
    o_ref[...] = jnp.maximum(jnp.maximum(eh, oh), ohp)


# ----------------------------------------------------------------------------
# Wrappers
# ----------------------------------------------------------------------------
def _conv_matmul(xm, entry, res2d=None):
    m = xm.shape[0]
    w, shift = entry["w"], entry["shift"]
    n = w.shape[1]
    if entry["split"] is not None:
        n1 = entry["split"]
        return pl.pallas_call(
            functools.partial(_mm_bn_dual_kernel, n1=n1),
            out_shape=(jax.ShapeDtypeStruct((m, n1), ACT_DTYPE),
                       jax.ShapeDtypeStruct((m, n - n1), ACT_DTYPE)),
            in_specs=[_vmem_spec() for _ in range(3)],
            out_specs=(_vmem_spec(), _vmem_spec()),
        )(xm, w, shift)
    if res2d is not None:
        return pl.pallas_call(
            _mm_bn_res_kernel,
            out_shape=jax.ShapeDtypeStruct((m, n), ACT_DTYPE),
            in_specs=[_vmem_spec() for _ in range(4)],
            out_specs=_vmem_spec(),
        )(xm, w, shift, res2d)
    return pl.pallas_call(
        functools.partial(_mm_bn_kernel, relu=entry["relu"]),
        out_shape=jax.ShapeDtypeStruct((m, n), ACT_DTYPE),
        in_specs=[_vmem_spec() for _ in range(3)],
        out_specs=_vmem_spec(),
    )(xm, w, shift)


def conv_apply(x, entry, res=None):
    """x: [Nb,H,W,Cin_eff] NHWC (ACT_DTYPE).  One patches op + one Pallas matmul."""
    nb, h, w_sp, cin = x.shape
    kh, kw, s, pad = entry["kh"], entry["kw"], entry["stride"], entry["pad"]
    ho = (h + 2 * pad - kh) // s + 1
    wo = (w_sp + 2 * pad - kw) // s + 1
    patches = jax.lax.conv_general_dilated_patches(
        x, (kh, kw), (s, s), [(pad, pad), (pad, pad)],
        dimension_numbers=("NHWC", "HWIO", "NHWC"))
    m = nb * ho * wo
    k_raw = cin * kh * kw
    xm = patches.reshape(m, k_raw)
    k = entry["w"].shape[0]
    if k != k_raw:                                  # lane-align K (stem: 147 -> 256)
        xm = jnp.pad(xm, ((0, 0), (0, k - k_raw)))
    xm = xm.astype(ACT_DTYPE)
    n = entry["w"].shape[1]
    if entry["split"] is not None:
        n1 = entry["split"]
        o1, o2 = _conv_matmul(xm, entry)
        return o1.reshape(nb, ho, wo, n1), o2.reshape(nb, ho, wo, n - n1)
    res2d = None if res is None else res.reshape(m, n).astype(ACT_DTYPE)
    out = _conv_matmul(xm, entry, res2d)
    return out.reshape(nb, ho, wo, n)


def maxpool2d_3x3s2p1(x):
    """MaxPool2d(kernel=3, stride=2, padding=1) on NHWC, one Pallas kernel."""
    nb, h, w, c = x.shape
    assert h % 2 == 0 and w % 2 == 0
    ho, wo = h // 2, w // 2
    xw = x.reshape(nb, h, wo, 2, c)
    ew = xw[:, :, :, 0, :]                          # columns 2*wo
    ow = xw[:, :, :, 1, :]                          # columns 2*wo + 1
    neg = jnp.full((nb, h, 1, c), jnp.finfo(x.dtype).min, x.dtype)
    owp = jnp.concatenate([neg, ow[:, :, :-1, :]], axis=2)   # columns 2*wo - 1
    return pl.pallas_call(
        _maxpool_kernel,
        out_shape=jax.ShapeDtypeStruct((nb, ho, wo, c), x.dtype),
        in_specs=[_vmem_spec() for _ in range(3)],
        out_specs=_vmem_spec(),
    )(ew, ow, owp)


# ----------------------------------------------------------------------------
# Host-side weight preparation (eager, outside jit)
# ----------------------------------------------------------------------------
@functools.lru_cache(maxsize=None)
def _feature_order(cin, kh, kw):
    """Probe conv_general_dilated_patches once (eagerly) to learn which (c,i,j)
    each flattened patch feature reads -> no assumption about its ordering."""
    probe = np.arange(cin * kh * kw, dtype=np.float32).reshape(1, kh, kw, cin)
    pat = jax.lax.conv_general_dilated_patches(
        jnp.asarray(probe), (kh, kw), (1, 1), [(0, 0), (0, 0)],
        dimension_numbers=("NHWC", "HWIO", "NHWC"),
        precision=jax.lax.Precision.HIGHEST)
    order = np.rint(np.asarray(jax.device_get(pat))).astype(np.int64).reshape(-1)
    assert sorted(order.tolist()) == list(range(cin * kh * kw)), \
        "unexpected patch feature ordering"
    c = order % cin
    spatial = order // cin
    return c, spatial // kw, spatial % kw


def _conv_entry(w, gamma, beta, *, stride, pad, cin_eff, cout_pad=None,
                k_pad=None, ds=None, relu=True):
    """Fold eval-mode BN into the weights, pad Cin/Cout, reorder the weight
    matrix to the patches feature order, optionally fuse a 1x1 downsample."""
    w = np.asarray(w, np.float32)
    gamma = np.asarray(gamma, np.float32)
    beta = np.asarray(beta, np.float32)
    cout, cin, kh, kw = w.shape
    co = cout_pad if cout_pad is not None else cout
    scale = gamma / np.sqrt(1.0 + BN_EPS)           # running_mean=0, running_var=1
    w_full = np.zeros((co, cin_eff, kh, kw), np.float32)
    w_full[:cout, :cin] = w * scale[:, None, None, None]
    shift = np.zeros((co,), np.float32)
    shift[:cout] = beta
    split = None
    if ds is not None:                              # fuse 1x1 stride-s downsample
        wd, gd, bd = (np.asarray(a, np.float32) for a in ds)
        cds, cind = wd.shape[0], wd.shape[1]
        wds_full = np.zeros((cds, cin_eff, kh, kw), np.float32)
        wds_full[:, :cind, pad, pad] = wd[:, :, 0, 0] * (gd / np.sqrt(1.0 + BN_EPS))[:, None]
        w_full = np.concatenate([w_full, wds_full], axis=0)
        shift = np.concatenate([shift, bd])
        split = co
    c_idx, i_idx, j_idx = _feature_order(cin_eff, kh, kw)
    w_mat = w_full[:, c_idx, i_idx, j_idx]          # [N_total, K_raw]
    k_raw = cin_eff * kh * kw
    k = k_pad if k_pad is not None else k_raw
    if k > k_raw:
        w_mat = np.concatenate(
            [w_mat, np.zeros((w_mat.shape[0], k - k_raw), np.float32)], axis=1)
    return {"w": jnp.asarray(w_mat.T, ACT_DTYPE),            # [K, N_total]
            "shift": jnp.asarray(shift[None, :], jnp.float32),
            "kh": kh, "kw": kw, "stride": stride, "pad": pad,
            "split": split, "relu": relu}


def prepare_weights(params):
    p = {k: np.asarray(jax.device_get(v), np.float32) for k, v in params.items()}
    prep = {"stem": _conv_entry(p["conv1.w"], p["bn1.w"], p["bn1.b"],
                                stride=2, pad=3, cin_eff=3, cout_pad=128,
                                k_pad=256)}
    blocks = []
    in_eff = 128
    for li, out_c in enumerate(LAYER_CHANNELS, start=1):
        out_eff = max(out_c, 128)
        for bi in range(2):
            pref = f"layer{li}.{bi}"
            stride = 2 if (li > 1 and bi == 0) else 1
            cin_eff = in_eff if bi == 0 else out_eff
            ds = None
            if li > 1 and bi == 0:
                ds = (p[f"{pref}.ds.conv.w"], p[f"{pref}.ds.bn.w"],
                      p[f"{pref}.ds.bn.b"])
            conv1 = _conv_entry(p[f"{pref}.conv1.w"], p[f"{pref}.bn1.w"],
                                p[f"{pref}.bn1.b"], stride=stride, pad=1,
                                cin_eff=cin_eff, cout_pad=out_eff, ds=ds)
            conv2 = _conv_entry(p[f"{pref}.conv2.w"], p[f"{pref}.bn2.w"],
                                p[f"{pref}.bn2.b"], stride=1, pad=1,
                                cin_eff=out_eff, cout_pad=out_eff)
            blocks.append({"conv1": conv1, "conv2": conv2})
        in_eff = out_eff
    prep["blocks"] = blocks
    # encoder.fc (512->2) and frontend Linear (2->2) fused algebraically
    # (valid because Dropout is eval-mode identity).
    # TODO(synk): training-mode Dropout(0.5) has no deterministic Pallas equivalent here.
    prep["head_w"] = jnp.asarray(p["frontend.w"] @ p["fc.w"], jnp.float32)   # [2,512]
    prep["head_b"] = jnp.asarray(p["frontend.w"] @ p["fc.b"] + p["frontend.b"],
                                 jnp.float32)
    return prep


# ----------------------------------------------------------------------------
# Parameters: all N(0, 0.01), matching init_encoder_weights / init_frontend_weights
# ----------------------------------------------------------------------------
def param_shapes():
    shapes = {"conv1.w": (64, 3, 7, 7), "bn1.w": (64,), "bn1.b": (64,)}
    in_c = 64
    for li, out_c in enumerate(LAYER_CHANNELS, start=1):
        for bi in range(2):
            pref = f"layer{li}.{bi}"
            stride = 2 if (li > 1 and bi == 0) else 1
            cin = in_c if bi == 0 else out_c
            shapes[f"{pref}.conv1.w"] = (out_c, cin, 3, 3)
            shapes[f"{pref}.bn1.w"] = (out_c,)
            shapes[f"{pref}.bn1.b"] = (out_c,)
            shapes[f"{pref}.conv2.w"] = (out_c, out_c, 3, 3)
            shapes[f"{pref}.bn2.w"] = (out_c,)
            shapes[f"{pref}.bn2.b"] = (out_c,)
            if bi == 0 and (stride != 1 or cin != out_c):
                shapes[f"{pref}.ds.conv.w"] = (out_c, cin, 1, 1)
                shapes[f"{pref}.ds.bn.w"] = (out_c,)
                shapes[f"{pref}.ds.bn.b"] = (out_c,)
        in_c = out_c
    shapes["fc.w"] = (2, 512)
    shapes["fc.b"] = (2,)
    shapes["frontend.w"] = (2, 2)
    shapes["frontend.b"] = (2,)
    return shapes


def init_params(seed=42):
    shapes = param_shapes()
    keys = jax.random.split(jax.random.PRNGKey(seed), len(shapes))
    return {name: 0.01 * jax.random.normal(k, shp, jnp.float32)
            for (name, shp), k in zip(shapes.items(), keys)}


# ----------------------------------------------------------------------------
# Forward pass: ResNet-18 encoder -> Linear(512,2) -> Dropout -> Linear(2,2)
# ----------------------------------------------------------------------------
def yoda_forward(x_nchw, prep):
    # NCHW (PyTorch) -> NHWC once at the boundary; activations stay NHWC bf16.
    x = jnp.transpose(x_nchw, (0, 2, 3, 1)).astype(ACT_DTYPE)
    x = conv_apply(x, prep["stem"])                       # conv1 + BN + ReLU
    x = maxpool2d_3x3s2p1(x)
    for blk in prep["blocks"]:
        if blk["conv1"]["split"] is not None:             # conv1 (+ fused 1x1 downsample)
            out1, identity = conv_apply(x, blk["conv1"])
        else:
            identity = x
            out1 = conv_apply(x, blk["conv1"])
        # conv2 + BN + residual add + ReLU fused into one Pallas call
        x = conv_apply(out1, blk["conv2"], res=identity)
    # AdaptiveAvgPool2d((1,1)) + flatten + fused (fc o dropout o frontend) affine
    feat = jnp.mean(x.astype(jnp.float32), axis=(1, 2))   # [Nb, 512]
    return feat @ prep["head_w"].T + prep["head_b"]


# ----------------------------------------------------------------------------
# Self-checks against lax references (fail loudly rather than silently wrong)
# ----------------------------------------------------------------------------
def _lax_conv(x, w_oihw, stride, pad):
    w_hwio = jnp.transpose(w_oihw, (2, 3, 1, 0)).astype(ACT_DTYPE)
    return jax.lax.conv_general_dilated(
        x, w_hwio, (stride, stride), [(pad, pad), (pad, pad)],
        dimension_numbers=("NHWC", "HWIO", "NHWC"),
        preferred_element_type=jnp.float32)


def _check_conv_path():
    ks = jax.random.split(jax.random.PRNGKey(123), 3)
    x = jax.random.normal(ks[0], (2, 8, 8, 64), jnp.float32).astype(ACT_DTYPE)
    w = 0.05 * jax.random.normal(ks[1], (128, 64, 3, 3), jnp.float32)
    beta = 0.1 * jax.random.normal(ks[2], (128,), jnp.float32)
    gamma = jnp.full((128,), float(np.sqrt(1.0 + BN_EPS)), jnp.float32)  # scale == 1
    entry = _conv_entry(w, gamma, beta, stride=2, pad=1, cin_eff=64, relu=False)
    out = conv_apply(x, entry).astype(jnp.float32)
    ref = _lax_conv(x, w, 2, 1) + beta
    assert bool(jnp.allclose(out, ref, atol=2e-2, rtol=5e-2)), "conv self-check failed"


def _check_dual_path():
    ks = jax.random.split(jax.random.PRNGKey(321), 5)
    x = jax.random.normal(ks[0], (2, 8, 8, 64), jnp.float32).astype(ACT_DTYPE)
    w1 = 0.05 * jax.random.normal(ks[1], (128, 64, 3, 3), jnp.float32)
    b1 = 0.1 * jax.random.normal(ks[2], (128,), jnp.float32)
    wd = 0.05 * jax.random.normal(ks[3], (128, 64, 1, 1), jnp.float32)
    bd = 0.1 * jax.random.normal(ks[4], (128,), jnp.float32)
    g = jnp.full((128,), float(np.sqrt(1.0 + BN_EPS)), jnp.float32)
    entry = _conv_entry(w1, g, b1, stride=2, pad=1, cin_eff=64, ds=(wd, g, bd))
    o1, o2 = conv_apply(x, entry)
    ref1 = jnp.maximum(_lax_conv(x, w1, 2, 1) + b1, 0.0)
    ref2 = _lax_conv(x, wd, 2, 0) + bd
    assert bool(jnp.allclose(o1.astype(jnp.float32), ref1, atol=2e-2, rtol=5e-2)), \
        "fused conv1 self-check failed"
    assert bool(jnp.allclose(o2.astype(jnp.float32), ref2, atol=2e-2, rtol=5e-2)), \
        "fused downsample self-check failed"


def _check_maxpool():
    x = jax.random.normal(jax.random.PRNGKey(777), (2, 16, 16, 128),
                          jnp.float32).astype(ACT_DTYPE)
    out = maxpool2d_3x3s2p1(x)
    ref = jax.lax.reduce_window(
        x, jnp.array(-jnp.inf, x.dtype), jax.lax.max,
        (1, 3, 3, 1), (1, 2, 2, 1), [(0, 0), (1, 1), (1, 1), (0, 0)])
    assert bool(jnp.array_equal(out, ref)), "maxpool self-check failed"


# ----------------------------------------------------------------------------
if __name__ == "__main__":
    _check_conv_path()
    _check_dual_path()
    _check_maxpool()

    params = init_params(seed=42)
    prep = prepare_weights(params)

    x = jax.random.normal(jax.random.PRNGKey(0), (2, 3, 32, 32), jnp.float32)  # NCHW

    fwd = jax.jit(lambda xx: yoda_forward(xx, prep))
    out = fwd(x)
    jax.block_until_ready(out)

    assert out.shape == (2, 2) and out.dtype == jnp.float32
    assert bool(jnp.all(jnp.isfinite(out)))
    print("KERNEL_OK")
</pallas_src>

<mosaic_0001>
module attributes {stable_mosaic.version = 11 : i64} {
  func.func @_mm_bn_kernel(%arg0: memref<32x576xbf16, #tpu.memory_space<vmem>>, %arg1: memref<576x128xbf16, #tpu.memory_space<vmem>>, %arg2: memref<1x128xf32, #tpu.memory_space<vmem>>, %arg3: memref<32x128xbf16, #tpu.memory_space<vmem>>) attributes {dimension_semantics = [], scalar_prefetch = 0 : i64, scratch_operands = 0 : i64, tpu.core_type = #tpu.core_type<tc>} {
    %c0 = arith.constant 0 : index
    %c0_0 = arith.constant 0 : index
    %0 = vector.load %arg0[%c0, %c0_0] : memref<32x576xbf16, #tpu.memory_space<vmem>>, vector<32x576xbf16>
    %c0_1 = arith.constant 0 : index
    %c0_2 = arith.constant 0 : index
    %1 = vector.load %arg1[%c0_1, %c0_2] : memref<576x128xbf16, #tpu.memory_space<vmem>>, vector<576x128xbf16>
    %cst = arith.constant dense<0.000000e+00> : vector<32x128xf32>
    %2 = tpu.matmul %0, %1, %cst {dimension_numbers = #tpu.dot_dimension_numbers<[1], [0], [0], [1], [0, 0, 1, 1], [], []>} : vector<32x576xbf16>, vector<576x128xbf16>, vector<32x128xf32> -> vector<32x128xf32>
    %c0_3 = arith.constant 0 : index
    %c0_4 = arith.constant 0 : index
    %3 = vector.load %arg2[%c0_3, %c0_4] : memref<1x128xf32, #tpu.memory_space<vmem>>, vector<1x128xf32>
    %4 = vector.broadcast %3 : vector<1x128xf32> to vector<32x128xf32>
    %5 = arith.addf %2, %4 : vector<32x128xf32>
    %6 = arith.truncf %5 : vector<32x128xf32> to vector<32x128xbf16>
    %c0_5 = arith.constant 0 : index
    %c0_6 = arith.constant 0 : index
    %7 = vector.load %arg3[%c0_5, %c0_6] : memref<32x128xbf16, #tpu.memory_space<vmem>>, vector<32x128xbf16>
    tpu.vector_store %arg3[%c0_5, %c0_6], %6 {strides = array<i32>} : memref<32x128xbf16, #tpu.memory_space<vmem>>, vector<32x128xbf16>,
    return
  }
}

</mosaic_0001>

<bundles_post_ra>
// kernel: tpu_custom_call.1
= control target key start
LH: loop header
LB: loop body
LE: loop exit
PB: predicated region body
PF: predicated region fallthrough
CT: control target
= control target key end

     0   :  { %8 = vsyncpa [#allocation3], 0  ;;  %s936_s0 = inlined_call_operand.hbm [shape: bf16[32,576], index: 0, kind: input, shape index: {}]   ;;  %s937_s1 = inlined_call_operand.hbm [shape: bf16[576,128], index: 1, kind: input, shape index: {}]   ;;  %s938_s2 = inlined_call_operand.vmem [shape: f32[1,128], index: 2, kind: input, shape index: {}]   ;;  %s939_s3 = inlined_call_operand.hbm [shape: bf16[32,128], index: 3, kind: output, shape index: {}]  }
   0x1   :  { %9 = vsyncpa [#allocation6], 0 }
   0x2   :  { %10 = vsyncpa [#allocation4], 0  ;;  %s864_s12 = smov [#allocation2]   ;;  %s792_s16 = scalar_lea.hbm %s936_s0, 1280 }
   0x3   :  { %s16_s13 = sshll.u32 %s864_s12, 4  ;;  %p793_p0 = scmp.ne.s32.totalorder %s936_s0, %s792_s16  ;;  %s17_s13 = int_to_ptr.vmem [resolvable:$true] %s16_s13 }
   0x4   :  { %p796_p1 = scmp.lt.u32.totalorder %s792_s16, %s936_s0 }
   0x6   :  { %p798_p2 = pnand %p796_p1, %p793_p0 }
   0x8   :  { %801 = shalt.err (!%p798_p2)
}
   0x9   :  { %s802_s21 = scalar_lea.vmem %s17_s13, 1280  ;;  %p807_p4 = scmp.lt.s32.totalorder %s17_s13, %s17_s13 }
   0xa   :  { %p803_p3 = scmp.ne.s32.totalorder %s17_s13, %s802_s21  ;;  %p808_p5 = scmp.lt.s32.totalorder %s802_s21, %s802_s21 }
   0xc   :  { %p809_p6 = por %p808_p5, %p807_p4 }
   0xe   :  { %p810_p7 = pnand %p809_p6, %p803_p3 }
  0x10   :  { %813 = shalt.err (!%p810_p7)
}
  0x11   :  { %s865_s22 = smov 320   ;;  %s866_s23 = smov 20  }
  0x12   :  { %22 = dma.hbm_to_vmem [thread:$0]  %s936_s0, 1280, %s17_s13, [#allocation3], %s865_s22, %s865_s22, %s866_s23  }
  0x13   :  { %s867_s26 = smov [#allocation5]   ;;  %s814_s30 = scalar_lea.hbm %s937_s1, 4608 }
  0x14   :  { %s28_s27 = sshll.u32 %s867_s26, 4  ;;  %p815_p8 = scmp.ne.s32.totalorder %s937_s1, %s814_s30  ;;  %s29_s27 = int_to_ptr.vmem [resolvable:$true] %s28_s27 }
  0x15   :  { %p818_p9 = scmp.lt.u32.totalorder %s814_s30, %s937_s1 }
  0x17   :  { %p820_p10 = pnand %p818_p9, %p815_p8 }
  0x19   :  { %823 = shalt.err (!%p820_p10)
}
  0x1a   :  { %s824_s8 = scalar_lea.vmem %s29_s27, 4608  ;;  %p829_p12 = scmp.lt.s32.totalorder %s29_s27, %s29_s27 }
  0x1b   :  { %p825_p11 = scmp.ne.s32.totalorder %s29_s27, %s824_s8  ;;  %p830_p13 = scmp.lt.s32.totalorder %s824_s8, %s824_s8 }
  0x1d   :  { %p831_p0 = por %p830_p13, %p829_p12 }
  0x1f   :  { %p832_p1 = pnand %p831_p0, %p825_p11 }
  0x21   :  { %835 = shalt.err (!%p832_p1)
}
  0x22   :  { %s868_s0 = smov 64   ;;  %s869_s9 = smov 4  }
  0x23   :  { %34 = dma.hbm_to_vmem [thread:$0]  %s937_s1, 4608, %s29_s27, [#allocation6], %s868_s0, %s868_s0, %s869_s9  }
  0x24   :  { %858 = dma.done.wait [#allocation3], 1280  }
  0x25   :  { %859 = vsyncadd [#allocation3], 4294966016 }
  0x26   :  { %860 = dma.done.wait [#allocation6], 4608  }
  0x27   :  { %861 = vsyncadd [#allocation6], 4294962688  ;;  %v742_v0 = vld [vmem:[#allocation5 + $0x40] sm:$0xff]   ;;  %v746_v4 = vld [vmem:[#allocation5 + $0x48] sm:$0xff]   ;;  %vm401_vm0 = vcmask 523264  }
  0x28   :  { %v743_v1 = vld [vmem:[#allocation5] sm:$0xff]   ;;  %661 = vmatprep.subr.bf16.mxu0 %v742_v0  ;;  %v747_v5 = vld [vmem:[#allocation5 + $0x8] sm:$0xff]   ;;  %v750_v8 = vld [vmem:[#allocation5 + $0x50] sm:$0xff]  }
  0x29   :  { %v744_v2 = vld [vmem:[#allocation5 + $0xc0] sm:$0xff]   ;;  %662 = vmatpush3.bf16.msra.mxu0 %v743_v1  ;;  %v748_v6 = vld [vmem:[#allocation5 + $0xc8] sm:$0xff]   ;;  %v751_v9 = vld [vmem:[#allocation5 + $0x10] sm:$0xff]  }
  0x2a   :  { %v745_v3 = vld [vmem:[#allocation5 + $0x80] sm:$0xff]   ;;  %689 = vmatprep.subr.bf16.mxu1 %v744_v2  ;;  %663 = vmatprep.subr.bf16.mxu0 %v746_v4  ;;  %v749_v7 = vld [vmem:[#allocation5 + $0x88] sm:$0xff]   ;;  %v752_v10 = vld [vmem:[#allocation5 + $0xd0] sm:$0xff]  }
  0x2b   :  { %690 = vmatpush3.bf16.msra.mxu1 %v745_v3  ;;  %v753_v11 = vld [vmem:[#allocation5 + $0x90] sm:$0xff]   ;;  %v754_v12 = vld [vmem:[#allocation5 + $0x58] sm:$0xff]   ;;  %v758_v16 = vld [vmem:[#allocation5 + $0x60] sm:$0xff]  }
  0x2c   :  { %691 = vmatprep.subr.bf16.mxu1 %v748_v6  ;;  %v755_v13 = vld [vmem:[#allocation5 + $0x18] sm:$0xff]   ;;  %v759_v17 = vld [vmem:[#allocation5 + $0x20] sm:$0xff]   ;;  %v762_v20 = vld [vmem:[#allocation5 + $0x68] sm:$0xff]  }
  0x2d   :  { %664 = vmatpush3.bf16.msra.mxu0 %v747_v5  ;;  %v756_v14 = vld [vmem:[#allocation5 + $0xd8] sm:$0xff]   ;;  %v760_v18 = vld [vmem:[#allocation5 + $0xe0] sm:$0xff]   ;;  %v763_v21 = vld [vmem:[#allocation5 + $0x28] sm:$0xff]  }
  0x2e   :  { %665 = vmatprep.subr.bf16.mxu0 %v750_v8  ;;  %v757_v15 = vld [vmem:[#allocation5 + $0x98] sm:$0xff]   ;;  %v761_v19 = vld [vmem:[#allocation5 + $0xa0] sm:$0xff]   ;;  %v764_v22 = vld [vmem:[#allocation5 + $0xe8] sm:$0xff]  }
  0x2f   :  { %692 = vmatpush3.bf16.msra.mxu1 %v749_v7  ;;  %v765_v23 = vld [vmem:[#allocation5 + $0xa8] sm:$0xff]   ;;  %v766_v24 = vld [vmem:[#allocation5 + $0x70] sm:$0xff]   ;;  %v770_v28 = vld [vmem:[#allocation5 + $0x78] sm:$0xff]  }
  0x30   :  { %693 = vmatprep.subr.bf16.mxu1 %v752_v10  ;;  %v767_v25 = vld [vmem:[#allocation5 + $0x30] sm:$0xff]   ;;  %v771_v29 = vld [vmem:[#allocation5 + $0x38] sm:$0xff]   ;;  %v777_v34 = vld [vmem:[#allocation5 + $0x100] sm:$0xff]  }
  0x31   :  { %666 = vmatpush3.bf16.msra.mxu0 %v751_v9  ;;  %v768_v26 = vld [vmem:[#allocation5 + $0xf0] sm:$0xff]   ;;  %v772_v30 = vld [vmem:[#allocation5 + $0xf8] sm:$0xff]   ;;  %v781_v37 = vld [vmem:[#allocation5 + $0x108] sm:$0xff]  }
  0x32   :  { %667 = vmatprep.subr.bf16.mxu0 %v754_v12  ;;  %v769_v27 = vld [vmem:[#allocation5 + $0xb0] sm:$0xff]   ;;  %v776_v33 = vld [vmem:[#allocation5 + $0xb8] sm:$0xff]  }
  0x33   :  { %694 = vmatpush3.bf16.msra.mxu1 %v753_v11  ;;  %v773_v31 = vld [vmem:[#allocation2] ss:$20 sps:$4 sm:$0xff]   ;;  %v775_v32 = vld [vmem:[#allocation2 + $0x4] ss:$20 sps:$4 sm:$0xff]   ;;  %v778_v35 = vld [vmem:[#allocation2 + $0x8] ss:$20 sps:$4 sm:$0xff]  }
  0x34   :  { %695 = vmatprep.subr.bf16.mxu1 %v756_v14  ;;  %440 = vmatprep.mubr.bf16.mxu0 %v775_v32  ;;  %v780_v36 = vld [vmem:[#allocation2 + $0xc] ss:$20 sps:$4 sm:$0xff]   ;;  %v784_v39 = vld [vmem:[#allocation2 + $0x28] ss:$20 sps:$4 sm:$0xff]   ;;  %v788_v42 = vld [vmem:[#allocation2 + $0x30] ss:$20 sps:$4 sm:$0xff]  }
  0x35   :  { %668 = vmatpush3.bf16.msra.mxu0 %v755_v13  ;;  %489 = vmatprep.mubr.bf16.mxu1 %v780_v36  ;;  %v782_v38 = vld [vmem:[#allocation2 + $0x2c] ss:$20 sps:$4 sm:$0xff]   ;;  %v786_v41 = vld [vmem:[#allocation2 + $0x34] ss:$20 sps:$4 sm:$0xff]   ;;  %v790_v44 = vld [vmem:[#allocation2 + $0x10] ss:$20 sps:$4 sm:$0xff]  }
  0x36   :  { %669 = vmatprep.subr.bf16.mxu0 %v758_v16  ;;  %v785_v40 = vld [vmem:[#allocation5 + $0x110] sm:$0xff]   ;;  %v789_v43 = vld [vmem:[#allocation5 + $0x118] sm:$0xff]  }
  0x37   :  { %696 = vmatpush3.bf16.msra.mxu1 %v757_v15  ;;  %v791_v45 = vld [vmem:[#allocation2 + $0x38] ss:$20 sps:$4 sm:$0xff]   ;;  %v593_v47 = vld [vmem:[%s938_s2] ss:$0 sm:$0xff]  ;;  %s870_s2 = smov [#allocation7]  }
  0x38   :  { %697 = vmatprep.subr.bf16.mxu1 %v760_v18  ;;  %s580_s13 = sshll.u32 %s870_s2, 4  ;;  %s581_s13 = int_to_ptr.vmem [resolvable:$true] %s580_s13 }
  0x39   :  { %670 = vmatpush3.bf16.msra.mxu0 %v759_v17  ;;  %s836_s14 = scalar_lea.vmem %s581_s13, 256  ;;  %p841_p3 = scmp.lt.s32.totalorder %s581_s13, %s581_s13 }
  0x3a   :  { %671 = vmatprep.subr.bf16.mxu0 %v762_v20  ;;  %p837_p2 = scmp.ne.s32.totalorder %s581_s13, %s836_s14  ;;  %p842_p4 = scmp.lt.s32.totalorder %s836_s14, %s836_s14 }
  0x3b   :  { %698 = vmatpush3.bf16.msra.mxu1 %v761_v19 }
  0x3c   :  { %699 = vmatprep.subr.bf16.mxu1 %v764_v22  ;;  %p843_p5 = por %p842_p4, %p841_p3 }
  0x3d   :  { %672 = vmatpush3.bf16.msra.mxu0 %v763_v21 }
  0x3e   :  { %673 = vmatprep.subr.bf16.mxu0 %v766_v24  ;;  %p844_p6 = pnand %p843_p5, %p837_p2 }
  0x3f   :  { %700 = vmatpush3.bf16.msra.mxu1 %v765_v23 }
  0x40   :  { %701 = vmatprep.subr.bf16.mxu1 %v768_v26 }
  0x41   :  { %674 = vmatpush3.bf16.msra.mxu0 %v767_v25 }
  0x42   :  { %675 = vmatprep.subr.bf16.mxu0 %v770_v28 }
  0x43   :  { %702 = vmatpush3.bf16.msra.mxu1 %v769_v27 }
  0x44   :  { %703 = vmatprep.subr.bf16.mxu1 %v772_v30 }
  0x45   :  { %676 = vmatpush3.bf16.msra.mxu0 %v771_v29 }
  0x46   :  { %723 = vmatprep.subr.bf16.mxu0 %v777_v34 }
  0x47   :  { %704 = vmatpush3.bf16.msra.mxu1 %v776_v33 }
  0x48   :  { %441 = vmatmul.mubr.bf16.vlgmr.msra.gmra.mrb[0].mxu0 %v773_v31 }
  0x49   :  { %724 = vmatpush3.bf16.msra.mxu0 %v777_v34  ;;  %448 = vmatprep.mubr.bf16.mxu0 %v782_v38 }
  0x4a   :  { %490 = vmatmul.mubr.bf16.vlgmr.msra.gmra.mrb[0].mxu1 %v778_v35  ;;  %725 = vmatprep.subr.bf16.mxu0 %v781_v37 }
  0x4b   :  { %497 = vmatprep.mubr.bf16.mxu1 %v786_v41 }
  0x4d   :  { %726 = vmatpush3.bf16.msra.mxu0 %v781_v37 }
  0x4e   :  { %727 = vmatprep.subr.bf16.mxu0 %v785_v40 }
  0x50   :  { %449 = vmatmul.mubr.bf16.gmra.mrb[4].mxu0 %v784_v39 }
  0x51   :  { %731 = vmatprep.mubr.msk.bf16.mxu0 %vm401_vm0, %v790_v44  ;;  %728 = vmatpush3.bf16.msra.mxu0 %v785_v40 }
  0x52   :  { %498 = vmatmul.mubr.bf16.gmra.mrb[4].mxu1 %v788_v42  ;;  %729 = vmatprep.subr.bf16.mxu0 %v789_v43 }
  0x55   :  { %730 = vmatpush3.bf16.msra.mxu0 %v789_v43 }
  0x58   :  { %732 = vmatmul.mubr.msk.bf16.vlgmr.msra.gmra.mrb[8].mxu0 %vm401_vm0, %v791_v45 }
 0x11b   :  { %v677_v46 = vpop.f32.mrb[0].mxu0 }
 0x11c   :  { %v678_v48 = vpop.f32.mrb[1].mxu0 }
 0x11d   :  { %v679_v49 = vadd.f32 %v678_v48, %v677_v46  ;;  %v680_v50 = vpop.f32.mrb[2].mxu0  ;;  %v705_v51 = vpop.f32.mrb[0].mxu1 }
 0x11e   :  { %v681_v52 = vpop.f32.mrb[3].mxu0  ;;  %v706_v55 = vpop.f32.mrb[1].mxu1 }
 0x11f   :  { %v443_v53 = vadd.f32 %v679_v49, %v593_v47  ;;  %v682_v54 = vadd.f32 %v681_v52, %v680_v50  ;;  %v707_v56 = vadd.f32 %v706_v55, %v705_v51  ;;  %v708_v57 = vpop.f32.mrb[2].mxu1 }
 0x120   :  { %v709_v59 = vpop.f32.mrb[3].mxu1 }
 0x121   :  { %v446_v58 = vadd.f32 %v682_v54, %v593_v47  ;;  %v710_v60 = vadd.f32 %v709_v59, %v708_v57  ;;  %v492_v61 = vadd.f32 %v707_v56, %v443_v53 }
 0x123   :  { %v683_v62 = vpop.f32.mrb[4].mxu0  ;;  %v495_v0 = vadd.f32 %v710_v60, %v446_v58 }
 0x124   :  { %v684_v63 = vpop.f32.mrb[5].mxu0 }
 0x125   :  { %v685_v1 = vadd.f32 %v684_v63, %v683_v62  ;;  %v686_v2 = vpop.f32.mrb[6].mxu0  ;;  %v711_v3 = vpop.f32.mrb[4].mxu1 }
 0x126   :  { %v687_v4 = vpop.f32.mrb[7].mxu0  ;;  %v712_v7 = vpop.f32.mrb[5].mxu1 }
 0x127   :  { %v451_v5 = vadd.f32 %v685_v1, %v593_v47  ;;  %v688_v6 = vadd.f32 %v687_v4, %v686_v2  ;;  %v713_v8 = vadd.f32 %v712_v7, %v711_v3  ;;  %v714_v9 = vpop.f32.mrb[6].mxu1 }
 0x128   :  { %v715_v11 = vpop.f32.mrb[7].mxu1 }
 0x129   :  { %v454_v10 = vadd.f32 %v688_v6, %v593_v47  ;;  %v716_v12 = vadd.f32 %v715_v11, %v714_v9  ;;  %v500_v13 = vadd.f32 %v713_v8, %v451_v5 }
 0x12b   :  { %v733_v14 = vpop.f32.mrb[8].mxu0  ;;  %v503_v15 = vadd.f32 %v716_v12, %v454_v10 }
 0x12c   :  { %v549_v16 = vadd.f32 %v733_v14, %v500_v13  ;;  %v540_v17 = vpop.f32.mrb[9].mxu0 }
 0x12d   :  { %v541_v18 = vadd.f32 %v540_v17, %v492_v61  ;;  %v734_v19 = vpop.f32.mrb[10].mxu0 }
 0x12e   :  { %v552_v20 = vadd.f32 %v734_v19, %v503_v15  ;;  %v543_v21 = vpop.f32.mrb[11].mxu0 }
 0x12f   :  { %v544_v22 = vadd.f32 %v543_v21, %v495_v0 }
 0x130   :  { %v658_v23 = vpack.c.bf16 %v552_v20, %v549_v16 }
 0x131   :  { %v653_v24 = vpack.c.bf16 %v544_v22, %v541_v18 }
 0x132   :  { %660 = vst [vmem:[#allocation7 + $0x8] sm:$0xff] %v658_v23  }
 0x133   :  { %654 = vst [vmem:[#allocation7] sm:$0xff] %v653_v24  }
 0x134   :  { %847 = shalt.err (!%p844_p6)
}
 0x135   :  { %s848_s17 = scalar_lea.hbm %s939_s3, 256 }
 0x136   :  { %p849_p7 = scmp.ne.s32.totalorder %s939_s3, %s848_s17  ;;  %p852_p8 = scmp.lt.u32.totalorder %s848_s17, %s939_s3 }
 0x138   :  { %p854_p9 = pnand %p852_p8, %p849_p7 }
 0x13a   :  { %857 = shalt.err (!%p854_p9)
}
 0x13b   :  { %586 = dma.vmem_to_hbm [thread:$0]  %s581_s13, 256, %s939_s3, [#allocation4], %s868_s0, %s868_s0, %s869_s9  }
 0x13c   :  { %862 = dma.done.wait [#allocation4], 256  }
 0x13d   :  { %863 = vsyncadd [#allocation4], 4294967040 }
 0x13e   :  { %590 = vsyncpa [#allocation3], 1 }
 0x13f   :  { %591 = vsyncpa [#allocation6], 1 }
 0x140   :  { %592 = vsyncpa [#allocation4], 1 }

</bundles_post_ra>
